<compile_context>
chip_gen: v7x
topology: tpu7x:2x2x1
jax: 0.10.0
libtpu: 0.0.40
codegen_flags: <defaults>
</compile_context>

<pallas_src>
from typing import NamedTuple

import jax
import jax.numpy as jnp
from jax.experimental import pallas as pl
from jax.experimental.pallas import tpu as pltpu


def _round_up(x, m):
    return ((x + m - 1) // m) * m


class EncoderParams(NamedTuple):
    wih_t: jax.Array   # (Hp, 3*Hp) bf16, gates [r | z | n], input-to-hidden, transposed
    whh_t: jax.Array   # (Hp, 3*Hp) bf16, hidden-to-hidden, transposed
    b_comb: jax.Array  # (1, 3*Hp) f32: [b_ir + b_hr | b_iz + b_hz | b_in]
    b_hn: jax.Array    # (1, Hp)   f32: b_hn (must be scaled by r, kept separate)
    hidden_size: int
    hidden_padded: int


def prepare_encoder_params(w_ih, w_hh, b_ih, b_hh, *, matmul_dtype=jnp.bfloat16):
    """One-time parameter prep (hoisted out of the per-step forward path)."""
    H = w_ih.shape[1]
    Hp = _round_up(H, 128)

    def transpose_pad(w):  # (3H, H) PyTorch layout -> (Hp, 3*Hp), per-gate zero-padded
        gates = []
        for g in range(3):
            wg = w[g * H:(g + 1) * H, :].T                       # (in=H, out=H)
            wg = jnp.pad(wg, ((0, Hp - H), (0, Hp - H)))
            gates.append(wg)
        return jnp.concatenate(gates, axis=1).astype(matmul_dtype)

    def pad_vec(v):
        return jnp.pad(v.astype(jnp.float32), (0, Hp - H))

    b_ir, b_iz, b_in = b_ih[:H], b_ih[H:2 * H], b_ih[2 * H:]
    b_hr, b_hz, b_hn = b_hh[:H], b_hh[H:2 * H], b_hh[2 * H:]
    b_comb = jnp.concatenate([pad_vec(b_ir + b_hr), pad_vec(b_iz + b_hz),
                              pad_vec(b_in)]).reshape(1, 3 * Hp)
    b_hn_p = pad_vec(b_hn).reshape(1, Hp)

    return EncoderParams(transpose_pad(w_ih), transpose_pad(w_hh),
                         b_comb, b_hn_p, H, Hp)


# ----------------------------- kernels ------------------------------------- #

def _gru_gates(x_f32, h_f32, wih_ref, whh_ref, bcomb_ref, bhn_ref):
    """Shared GRU cell math: bf16 MXU matmuls, f32 gate elementwise math."""
    Hp = h_f32.shape[-1]
    xb = x_f32.astype(jnp.bfloat16)
    hb = h_f32.astype(jnp.bfloat16)
    gi = jnp.dot(xb, wih_ref[...], preferred_element_type=jnp.float32) + bcomb_ref[...]
    gh = jnp.dot(hb, whh_ref[...], preferred_element_type=jnp.float32)
    r = jax.nn.sigmoid(gi[:, 0:Hp] + gh[:, 0:Hp])
    z = jax.nn.sigmoid(gi[:, Hp:2 * Hp] + gh[:, Hp:2 * Hp])
    n = jnp.tanh(gi[:, 2 * Hp:] + r * (gh[:, 2 * Hp:] + bhn_ref[...]))
    return (1.0 - z) * n + z * h_f32


def gru_cell_kernel(x_ref, h_ref, wih_ref, whh_ref, bcomb_ref, bhn_ref, out_ref):
    """Single GRU step; the single output aliases the hidden-state input buffer."""
    h_new = _gru_gates(x_ref[...].astype(jnp.float32),
                       h_ref[...].astype(jnp.float32),
                       wih_ref, whh_ref, bcomb_ref, bhn_ref)
    out_ref[...] = h_new.astype(out_ref.dtype)


def gru_seq_kernel(x_ref, h0_ref, wih_ref, whh_ref, bcomb_ref, bhn_ref,
                   out_ref, h_carry):
    """T timesteps inside one pallas_call; hidden carried in a f32 VMEM scratch."""
    @pl.when(pl.program_id(1) == 0)
    def _():
        h_carry[...] = h0_ref[...].astype(jnp.float32)

    h_new = _gru_gates(x_ref[0].astype(jnp.float32), h_carry[...],
                       wih_ref, whh_ref, bcomb_ref, bhn_ref)
    h_carry[...] = h_new
    out_ref[0] = h_new.astype(out_ref.dtype)


# --------------------------- pallas_call wrappers --------------------------- #

@jax.jit
def _gru_step(x, h0, wih_t, whh_t, b_comb, b_hn):
    B, H = h0.shape
    Hp = wih_t.shape[0]
    Bp = _round_up(B, 8)
    x_p = jnp.pad(x, ((0, Bp - B), (0, Hp - H)))
    h_p = jnp.pad(h0, ((0, Bp - B), (0, Hp - H)))

    vmem = pl.BlockSpec(memory_space=pltpu.MemorySpace.VMEM)
    out = pl.pallas_call(
        gru_cell_kernel,
        out_shape=jax.ShapeDtypeStruct((Bp, Hp), h0.dtype),
        in_specs=[vmem] * 6,
        out_specs=vmem,
        input_output_aliases={1: 0},     # h' overwrites h in place
    )(x_p, h_p, wih_t, whh_t, b_comb, b_hn)
    return out[:B, :H]


@jax.jit
def _gru_seq(xs, h0, wih_t, whh_t, b_comb, b_hn):
    T, B, H = xs.shape
    Hp = wih_t.shape[0]
    Bp = _round_up(B, 8)
    xs_p = jnp.pad(xs, ((0, 0), (0, Bp - B), (0, Hp - H)))
    h_p = jnp.pad(h0, ((0, Bp - B), (0, Hp - H)))

    # Batch tile: whole (padded) batch unless it splits cleanly into 64-row tiles,
    # which lets the two v7x TensorCores take independent "parallel" work.
    bt = 64 if (Bp > 64 and Bp % 64 == 0) else Bp
    grid = (Bp // bt, T)

    outs = pl.pallas_call(
        gru_seq_kernel,
        out_shape=jax.ShapeDtypeStruct((T, Bp, Hp), h0.dtype),
        grid_spec=pltpu.PrefetchScalarGridSpec(
            num_scalar_prefetch=0,
            grid=grid,
            in_specs=[
                pl.BlockSpec((1, bt, Hp), lambda b, t: (t, b, 0)),   # x_t
                pl.BlockSpec((bt, Hp), lambda b, t: (b, 0)),         # initial hidden
                pl.BlockSpec((Hp, 3 * Hp), lambda b, t: (0, 0)),     # W_ih (VMEM-resident)
                pl.BlockSpec((Hp, 3 * Hp), lambda b, t: (0, 0)),     # W_hh (VMEM-resident)
                pl.BlockSpec((1, 3 * Hp), lambda b, t: (0, 0)),      # combined bias
                pl.BlockSpec((1, Hp), lambda b, t: (0, 0)),          # b_hn
            ],
            out_specs=pl.BlockSpec((1, bt, Hp), lambda b, t: (t, b, 0)),
            scratch_shapes=[pltpu.VMEM((bt, Hp), jnp.float32)],      # f32 hidden carry
        ),
        compiler_params=pltpu.CompilerParams(
            dimension_semantics=("parallel", "arbitrary")),
    )(xs_p, h_p, wih_t, whh_t, b_comb, b_hn)
    return outs[:, :B, :H]


def encoder_rnn_forward(inp, hidden, params):
    """Mirrors EncoderRNN.forward: returns (output, hidden), both (1, B, hidden_size)."""
    B, H = hidden.shape[1], hidden.shape[2]
    # input.view(1, batch_size, -1): feature dim must equal hidden_size (nn.GRU(H, H)).
    x = inp.reshape(B, H)
    h0 = hidden.reshape(B, H)
    out = _gru_step(x, h0, params.wih_t, params.whh_t, params.b_comb, params.b_hn)
    out3 = out.reshape(1, B, H)
    return out3, out3            # output == hidden for seq_len=1, num_layers=1


def encoder_rnn_encode_sequence(inputs, hidden, params):
    """Drive the encoder over a whole sequence inside ONE pallas_call.

    inputs: (T, B, hidden_size), hidden: (1, B, hidden_size)
    returns (outputs (T, B, H), final hidden (1, B, H))
    """
    T, B = inputs.shape[0], hidden.shape[1]
    H = params.hidden_size
    xs = inputs.reshape(T, B, H)
    h0 = hidden.reshape(B, H)
    outs = _gru_seq(xs, h0, params.wih_t, params.whh_t, params.b_comb, params.b_hn)
    return outs, outs[-1].reshape(1, B, H)


# ------------------------------ reference ----------------------------------- #

def init_gru_params(key, hidden_size, dtype=jnp.float32):
    """Deterministic init matching nn.GRU(hidden, hidden) parameter shapes."""
    H = hidden_size
    bound = 1.0 / jnp.sqrt(jnp.asarray(H, jnp.float32))
    k1, k2, k3, k4 = jax.random.split(key, 4)
    w_ih = jax.random.uniform(k1, (3 * H, H), dtype, -bound, bound)
    w_hh = jax.random.uniform(k2, (3 * H, H), dtype, -bound, bound)
    b_ih = jax.random.uniform(k3, (3 * H,), dtype, -bound, bound)
    b_hh = jax.random.uniform(k4, (3 * H,), dtype, -bound, bound)
    return w_ih, w_hh, b_ih, b_hh


def gru_reference(x, h, w_ih, w_hh, b_ih, b_hh, matmul_dtype=jnp.float32):
    """Pure-JAX reference (PyTorch GRUCell math). matmul_dtype=bf16 mimics the kernel."""
    H = h.shape[-1]
    gi = jnp.dot(x.astype(matmul_dtype), w_ih.T.astype(matmul_dtype),
                 preferred_element_type=jnp.float32) + b_ih
    gh = jnp.dot(h.astype(matmul_dtype), w_hh.T.astype(matmul_dtype),
                 preferred_element_type=jnp.float32) + b_hh
    i_r, i_z, i_n = gi[:, :H], gi[:, H:2 * H], gi[:, 2 * H:]
    h_r, h_z, h_n = gh[:, :H], gh[:, H:2 * H], gh[:, 2 * H:]
    r = jax.nn.sigmoid(i_r + h_r)
    z = jax.nn.sigmoid(i_z + h_z)
    n = jnp.tanh(i_n + r * h_n)
    return (1.0 - z) * n + z * h


if __name__ == "__main__":
    batch = 8          # small stand-in for the script's batch_size = 100
    hidden_size = 32
    seq_len = 6

    key = jax.random.PRNGKey(0)
    k_in, k_seq, k_p = jax.random.split(key, 3)

    w_ih, w_hh, b_ih, b_hh = init_gru_params(k_p, hidden_size)
    params = prepare_encoder_params(w_ih, w_hh, b_ih, b_hh)

    # --- single-step forward (mirrors EncoderRNN.forward exactly) -----------
    x_in = jax.random.normal(k_in, (batch, hidden_size), jnp.float32)
    h_in = jnp.zeros((1, batch, hidden_size), jnp.float32)   # initHidden()

    output, hidden = encoder_rnn_forward(x_in, h_in, params)
    jax.block_until_ready((output, hidden))

    assert output.shape == (1, batch, hidden_size)
    assert hidden.shape == (1, batch, hidden_size)

    h0_2d = h_in.reshape(batch, hidden_size)
    out_2d = output.reshape(batch, hidden_size)
    ref_match = gru_reference(x_in, h0_2d, w_ih, w_hh, b_ih, b_hh, jnp.bfloat16)
    ref_f32 = gru_reference(x_in, h0_2d, w_ih, w_hh, b_ih, b_hh, jnp.float32)
    assert jnp.allclose(out_2d, ref_match, atol=1e-4, rtol=1e-4)
    assert jnp.allclose(out_2d, ref_f32, atol=3e-2, rtol=3e-2)
    assert jnp.allclose(hidden.reshape(batch, hidden_size), out_2d)

    # --- full-sequence encoder (one pallas_call, weights resident) ----------
    xs = jax.random.normal(k_seq, (seq_len, batch, hidden_size), jnp.float32)
    outs, h_T = encoder_rnn_encode_sequence(xs, h_in, params)
    jax.block_until_ready((outs, h_T))

    assert outs.shape == (seq_len, batch, hidden_size)
    assert h_T.shape == (1, batch, hidden_size)

    h_ref = h0_2d
    outs_ref = []
    for t in range(seq_len):
        h_ref = gru_reference(xs[t], h_ref, w_ih, w_hh, b_ih, b_hh, jnp.bfloat16)
        outs_ref.append(h_ref)
    outs_ref = jnp.stack(outs_ref)
    assert jnp.allclose(outs, outs_ref, atol=1e-3, rtol=1e-3)
    assert jnp.allclose(h_T.reshape(batch, hidden_size), outs_ref[-1],
                        atol=1e-3, rtol=1e-3)

    print("KERNEL_OK")
</pallas_src>

<mosaic_0001>
module attributes {stable_mosaic.version = 11 : i64} {
  func.func @gru_cell_kernel(%arg0: memref<8x128xf32, #tpu.memory_space<vmem>>, %arg1: memref<8x128xf32, #tpu.memory_space<vmem>>, %arg2: memref<128x384xbf16, #tpu.memory_space<vmem>>, %arg3: memref<128x384xbf16, #tpu.memory_space<vmem>>, %arg4: memref<1x384xf32, #tpu.memory_space<vmem>>, %arg5: memref<1x128xf32, #tpu.memory_space<vmem>>, %arg6: memref<8x128xf32, #tpu.memory_space<vmem>>) attributes {dimension_semantics = [], scalar_prefetch = 0 : i64, scratch_operands = 0 : i64, tpu.core_type = #tpu.core_type<tc>} {
    %c0 = arith.constant 0 : index
    %c0_0 = arith.constant 0 : index
    %0 = vector.load %arg0[%c0, %c0_0] : memref<8x128xf32, #tpu.memory_space<vmem>>, vector<8x128xf32>
    %c0_1 = arith.constant 0 : index
    %c0_2 = arith.constant 0 : index
    %1 = vector.load %arg1[%c0_1, %c0_2] : memref<8x128xf32, #tpu.memory_space<vmem>>, vector<8x128xf32>
    %2 = arith.truncf %0 : vector<8x128xf32> to vector<8x128xbf16>
    %3 = arith.truncf %1 : vector<8x128xf32> to vector<8x128xbf16>
    %c0_3 = arith.constant 0 : index
    %c0_4 = arith.constant 0 : index
    %4 = vector.load %arg2[%c0_3, %c0_4] : memref<128x384xbf16, #tpu.memory_space<vmem>>, vector<128x384xbf16>
    %cst = arith.constant dense<0.000000e+00> : vector<8x384xf32>
    %5 = tpu.matmul %2, %4, %cst {dimension_numbers = #tpu.dot_dimension_numbers<[1], [0], [0], [1], [0, 0, 1, 1], [], []>} : vector<8x128xbf16>, vector<128x384xbf16>, vector<8x384xf32> -> vector<8x384xf32>
    %c0_5 = arith.constant 0 : index
    %c0_6 = arith.constant 0 : index
    %6 = vector.load %arg4[%c0_5, %c0_6] : memref<1x384xf32, #tpu.memory_space<vmem>>, vector<1x384xf32>
    %7 = vector.broadcast %6 : vector<1x384xf32> to vector<8x384xf32>
    %8 = arith.addf %5, %7 : vector<8x384xf32>
    %c0_7 = arith.constant 0 : index
    %c0_8 = arith.constant 0 : index
    %9 = vector.load %arg3[%c0_7, %c0_8] : memref<128x384xbf16, #tpu.memory_space<vmem>>, vector<128x384xbf16>
    %cst_9 = arith.constant dense<0.000000e+00> : vector<8x384xf32>
    %10 = tpu.matmul %3, %9, %cst_9 {dimension_numbers = #tpu.dot_dimension_numbers<[1], [0], [0], [1], [0, 0, 1, 1], [], []>} : vector<8x128xbf16>, vector<128x384xbf16>, vector<8x384xf32> -> vector<8x384xf32>
    %11 = vector.extract_strided_slice %8 {offsets = [0, 0], sizes = [8, 128], strides = [1, 1]} : vector<8x384xf32> to vector<8x128xf32>
    %12 = vector.extract_strided_slice %10 {offsets = [0, 0], sizes = [8, 128], strides = [1, 1]} : vector<8x384xf32> to vector<8x128xf32>
    %13 = arith.addf %11, %12 : vector<8x128xf32>
    %14 = arith.negf %13 : vector<8x128xf32>
    %15 = math.exp %14 : vector<8x128xf32>
    %cst_10 = arith.constant 1.000000e+00 : f32
    %16 = vector.broadcast %cst_10 : f32 to vector<8x128xf32>
    %17 = arith.addf %16, %15 : vector<8x128xf32>
    %18 = arith.divf %16, %17 : vector<8x128xf32>
    %19 = vector.extract_strided_slice %8 {offsets = [0, 128], sizes = [8, 128], strides = [1, 1]} : vector<8x384xf32> to vector<8x128xf32>
    %20 = vector.extract_strided_slice %10 {offsets = [0, 128], sizes = [8, 128], strides = [1, 1]} : vector<8x384xf32> to vector<8x128xf32>
    %21 = arith.addf %19, %20 : vector<8x128xf32>
    %22 = arith.negf %21 : vector<8x128xf32>
    %23 = math.exp %22 : vector<8x128xf32>
    %cst_11 = arith.constant 1.000000e+00 : f32
    %24 = vector.broadcast %cst_11 : f32 to vector<8x128xf32>
    %25 = arith.addf %24, %23 : vector<8x128xf32>
    %26 = arith.divf %24, %25 : vector<8x128xf32>
    %27 = vector.extract_strided_slice %8 {offsets = [0, 256], sizes = [8, 128], strides = [1, 1]} : vector<8x384xf32> to vector<8x128xf32>
    %28 = vector.extract_strided_slice %10 {offsets = [0, 256], sizes = [8, 128], strides = [1, 1]} : vector<8x384xf32> to vector<8x128xf32>
    %c0_12 = arith.constant 0 : index
    %c0_13 = arith.constant 0 : index
    %29 = vector.load %arg5[%c0_12, %c0_13] : memref<1x128xf32, #tpu.memory_space<vmem>>, vector<1x128xf32>
    %30 = vector.broadcast %29 : vector<1x128xf32> to vector<8x128xf32>
    %31 = arith.addf %28, %30 : vector<8x128xf32>
    %32 = arith.mulf %18, %31 : vector<8x128xf32>
    %33 = arith.addf %27, %32 : vector<8x128xf32>
    %34 = math.tanh %33 : vector<8x128xf32>
    %cst_14 = arith.constant 1.000000e+00 : f32
    %35 = vector.broadcast %cst_14 : f32 to vector<8x128xf32>
    %36 = arith.subf %35, %26 : vector<8x128xf32>
    %37 = arith.mulf %36, %34 : vector<8x128xf32>
    %38 = arith.mulf %26, %1 : vector<8x128xf32>
    %39 = arith.addf %37, %38 : vector<8x128xf32>
    %c0_15 = arith.constant 0 : index
    %c0_16 = arith.constant 0 : index
    %40 = vector.load %arg6[%c0_15, %c0_16] : memref<8x128xf32, #tpu.memory_space<vmem>>, vector<8x128xf32>
    tpu.vector_store %arg6[%c0_15, %c0_16], %39 {strides = array<i32>} : memref<8x128xf32, #tpu.memory_space<vmem>>, vector<8x128xf32>,
    return
  }
}

</mosaic_0001>

<bundles_post_ra>
// kernel: _gru_step.1
= control target key start
LH: loop header
LB: loop body
LE: loop exit
PB: predicated region body
PF: predicated region fallthrough
CT: control target
= control target key end

     0   :  { %11 = vsyncpa [#allocation3], 0  ;;  %s938_s0 = inlined_call_operand.vmem [shape: f32[8,128], index: 0, kind: input, shape index: {}]   ;;  %s939_s1 = inlined_call_operand.vmem [shape: f32[8,128], index: 1, kind: input, shape index: {}, may-alias: {1,6}]   ;;  %s940_s2 = inlined_call_operand.hbm [shape: bf16[128,384], index: 2, kind: input, shape index: {}]   ;;  %s941_s3 = inlined_call_operand.hbm [shape: bf16[128,384], index: 3, kind: input, shape index: {}]   ;;  %s942_s4 = inlined_call_operand.vmem [shape: f32[1,384], index: 4, kind: input, shape index: {}]   ;;  %s943_s5 = inlined_call_operand.vmem [shape: f32[1,128], index: 5, kind: input, shape index: {}]   ;;  %s944_s6 = inlined_call_operand.vmem [shape: f32[8,128], index: 6, kind: output, shape index: {}, may-alias: {1,6}]  }
   0x1   :  { %12 = vsyncpa [#allocation5], 0  ;;  %s835_s21 = smov [#allocation2]   ;;  %s787_s25 = scalar_lea.hbm %s940_s2, 3072 }
   0x2   :  { %s22_s22 = sshll.u32 %s835_s21, 4  ;;  %p788_p0 = scmp.ne.s32.totalorder %s940_s2, %s787_s25  ;;  %s23_s22 = int_to_ptr.vmem [resolvable:$true] %s22_s22 }
   0x3   :  { %p791_p1 = scmp.lt.u32.totalorder %s787_s25, %s940_s2 }
   0x5   :  { %p793_p2 = pnand %p791_p1, %p788_p0 }
   0x7   :  { %796 = shalt.err (!%p793_p2)
}
   0x8   :  { %s797_s30 = scalar_lea.vmem %s23_s22, 3072  ;;  %p802_p4 = scmp.lt.s32.totalorder %s23_s22, %s23_s22 }
   0x9   :  { %p798_p3 = scmp.ne.s32.totalorder %s23_s22, %s797_s30  ;;  %p803_p5 = scmp.lt.s32.totalorder %s797_s30, %s797_s30 }
   0xb   :  { %p804_p6 = por %p803_p5, %p802_p4 }
   0xd   :  { %p805_p7 = pnand %p804_p6, %p798_p3 }
   0xf   :  { %808 = shalt.err (!%p805_p7)
}
  0x10   :  { %s836_s7 = smov 192   ;;  %s837_s8 = smov 12  }
  0x11   :  { %28 = dma.hbm_to_vmem [thread:$0]  %s940_s2, 3072, %s23_s22, [#allocation3], %s836_s7, %s836_s7, %s837_s8  }
  0x12   :  { %s838_s11 = smov [#allocation4]   ;;  %s809_s15 = scalar_lea.hbm %s941_s3, 3072 }
  0x13   :  { %s34_s12 = sshll.u32 %s838_s11, 4  ;;  %p810_p8 = scmp.ne.s32.totalorder %s941_s3, %s809_s15  ;;  %s35_s12 = int_to_ptr.vmem [resolvable:$true] %s34_s12 }
  0x14   :  { %p813_p9 = scmp.lt.u32.totalorder %s809_s15, %s941_s3 }
  0x16   :  { %p815_p10 = pnand %p813_p9, %p810_p8 }
  0x18   :  { %818 = shalt.err (!%p815_p10)
}
  0x19   :  { %s819_s20 = scalar_lea.vmem %s35_s12, 3072  ;;  %p824_p12 = scmp.lt.s32.totalorder %s35_s12, %s35_s12 }
  0x1a   :  { %p820_p11 = scmp.ne.s32.totalorder %s35_s12, %s819_s20  ;;  %p825_p13 = scmp.lt.s32.totalorder %s819_s20, %s819_s20 }
  0x1c   :  { %p826_p0 = por %p825_p13, %p824_p12 }
  0x1e   :  { %p827_p1 = pnand %p826_p0, %p820_p11 }
  0x20   :  { %830 = shalt.err (!%p827_p1)
}
  0x21   :  { %40 = dma.hbm_to_vmem [thread:$0]  %s941_s3, 3072, %s35_s12, [#allocation5], %s836_s7, %s836_s7, %s837_s8  }
  0x22   :  { %831 = dma.done.wait [#allocation3], 3072  }
  0x23   :  { %832 = vsyncadd [#allocation3], 4294964224 }
  0x24   :  { %833 = dma.done.wait [#allocation5], 3072  }
  0x25   :  { %834 = vsyncadd [#allocation5], 4294964224  ;;  %v839_v0 = vmov 0.0   ;;  %v840_v1 = vmov 0   ;;  %vm841_vm0 = vmmov 0   ;;  %v52_v23 = vld [vmem:[%s938_s0] sm:$0xff]  ;;  %v90_v58 = vlaneseq }
  0x26   :  { %660 = vmatprep.subr.bf16.mxu1 %v839_v0  ;;  %265 = vmatprep.mubr.bf16.mxu0 %v840_v1  ;;  %v713_v2 = vld [vmem:[#allocation2 + $0x4] ss:$12 sps:$4 sm:$0xff]   ;;  %v715_v3 = vld [vmem:[#allocation2] ss:$12 sps:$4 sm:$0xff]   ;;  %v716_v4 = vld [vmem:[#allocation2 + $0x1c] ss:$12 sps:$4 sm:$0xff]   ;;  %v54_v26 = vpack.c.bf16 %v52_v23, %v52_v23 }
  0x27   :  { %676 = vmatprep.mubr.msk.bf16.mxu1 %vm841_vm0, %v839_v0  ;;  %233 = vmatprep.subr.bf16.mxu0 %v713_v2  ;;  %v718_v5 = vld [vmem:[#allocation2 + $0x18] ss:$12 sps:$4 sm:$0xff]   ;;  %v719_v6 = vld [vmem:[#allocation2 + $0x34] ss:$12 sps:$4 sm:$0xff]   ;;  %v721_v7 = vld [vmem:[#allocation2 + $0x30] ss:$12 sps:$4 sm:$0xff]  }
  0x28   :  { %234 = vmatpush1.bf16.msra.mxu0 %v715_v3  ;;  %v722_v8 = vld [vmem:[#allocation2 + $0x4c] ss:$12 sps:$4 sm:$0xff]   ;;  %v733_v9 = vld [vmem:[#allocation2 + $0x8] ss:$12 sps:$4 sm:$0xff]   ;;  %v725_v11 = vld [vmem:[#allocation2 + $0x64] ss:$12 sps:$4 sm:$0xff]  }
  0x29   :  { %235 = vmatprep.subr.bf16.mxu0 %v716_v4  ;;  %v724_v10 = vld [vmem:[#allocation2 + $0x48] ss:$12 sps:$4 sm:$0xff]   ;;  %661 = vmatpush3.bf16.msra.mxu1 %v733_v9  ;;  %v737_v12 = vld [vmem:[#allocation2 + $0x20] ss:$12 sps:$4 sm:$0xff]   ;;  %v739_v14 = vld [vmem:[#allocation2 + $0x38] ss:$12 sps:$4 sm:$0xff]  }
  0x2a   :  { %662 = vmatprep.subr.bf16.mxu1 %v839_v0  ;;  %v727_v13 = vld [vmem:[#allocation2 + $0x60] ss:$12 sps:$4 sm:$0xff]   ;;  %v728_v15 = vld [vmem:[#allocation2 + $0x7c] ss:$12 sps:$4 sm:$0xff]   ;;  %v730_v16 = vld [vmem:[#allocation2 + $0x78] ss:$12 sps:$4 sm:$0xff]  }
  0x2b   :  { %v743_v17 = vld [vmem:[#allocation2 + $0x50] ss:$12 sps:$4 sm:$0xff]   ;;  %v731_v18 = vld [vmem:[#allocation2 + $0x94] ss:$12 sps:$4 sm:$0xff]   ;;  %v735_v21 = vld [vmem:[#allocation2 + $0xac] ss:$12 sps:$4 sm:$0xff]  }
  0x2c   :  { %236 = vmatpush1.bf16.msra.mxu0 %v718_v5  ;;  %v734_v19 = vld [vmem:[#allocation2 + $0x90] ss:$12 sps:$4 sm:$0xff]   ;;  %v747_v20 = vld [vmem:[#allocation2 + $0x68] ss:$12 sps:$4 sm:$0xff]   ;;  %v751_v24 = vld [vmem:[#allocation2 + $0x80] ss:$12 sps:$4 sm:$0xff]  }
  0x2d   :  { %237 = vmatprep.subr.bf16.mxu0 %v719_v6  ;;  %663 = vmatpush3.bf16.msra.mxu1 %v737_v12  ;;  %v738_v22 = vld [vmem:[#allocation2 + $0xa8] ss:$12 sps:$4 sm:$0xff]   ;;  %v742_v25 = vld [vmem:[#allocation4 + $0x4] ss:$12 sps:$4 sm:$0xff]   ;;  %v740_v27 = vld [vmem:[#allocation4] ss:$12 sps:$4 sm:$0xff]  }
  0x2e   :  { %664 = vmatprep.subr.bf16.mxu1 %v839_v0  ;;  %v755_v28 = vld [vmem:[#allocation2 + $0x98] ss:$12 sps:$4 sm:$0xff]   ;;  %v746_v29 = vld [vmem:[#allocation4 + $0x1c] ss:$12 sps:$4 sm:$0xff]   ;;  %v750_v32 = vld [vmem:[#allocation4 + $0x34] ss:$12 sps:$4 sm:$0xff]  }
  0x2f   :  { %v744_v30 = vld [vmem:[#allocation4 + $0x18] ss:$12 sps:$4 sm:$0xff]   ;;  %v759_v31 = vld [vmem:[#allocation2 + $0xb0] ss:$12 sps:$4 sm:$0xff]   ;;  %v766_v34 = vld [vmem:[#allocation4 + $0x8] ss:$12 sps:$4 sm:$0xff]  }
  0x30   :  { %238 = vmatpush1.bf16.msra.mxu0 %v721_v7  ;;  %v748_v33 = vld [vmem:[#allocation4 + $0x30] ss:$12 sps:$4 sm:$0xff]   ;;  %v754_v35 = vld [vmem:[#allocation4 + $0x4c] ss:$12 sps:$4 sm:$0xff]   ;;  %v752_v36 = vld [vmem:[#allocation4 + $0x48] ss:$12 sps:$4 sm:$0xff]  }
  0x31   :  { %239 = vmatprep.subr.bf16.mxu0 %v722_v8  ;;  %665 = vmatpush3.bf16.msra.mxu1 %v739_v14  ;;  %v770_v37 = vld [vmem:[#allocation4 + $0x20] ss:$12 sps:$4 sm:$0xff]   ;;  %v758_v38 = vld [vmem:[#allocation4 + $0x64] ss:$12 sps:$4 sm:$0xff]   ;;  %v762_v41 = vld [vmem:[#allocation4 + $0x7c] ss:$12 sps:$4 sm:$0xff]  }
  0x32   :  { %666 = vmatprep.subr.bf16.mxu1 %v839_v0  ;;  %v756_v39 = vld [vmem:[#allocation4 + $0x60] ss:$12 sps:$4 sm:$0xff]   ;;  %v771_v40 = vld [vmem:[#allocation4 + $0x38] ss:$12 sps:$4 sm:$0xff]   ;;  %v772_v43 = vld [vmem:[#allocation4 + $0x50] ss:$12 sps:$4 sm:$0xff]  }
  0x33   :  { %v760_v42 = vld [vmem:[#allocation4 + $0x78] ss:$12 sps:$4 sm:$0xff]   ;;  %v765_v44 = vld [vmem:[#allocation4 + $0x94] ss:$12 sps:$4 sm:$0xff]   ;;  %v763_v45 = vld [vmem:[#allocation4 + $0x90] ss:$12 sps:$4 sm:$0xff]  }
  0x34   :  { %240 = vmatpush1.bf16.msra.mxu0 %v724_v10  ;;  %v773_v46 = vld [vmem:[#allocation4 + $0x68] ss:$12 sps:$4 sm:$0xff]   ;;  %v769_v47 = vld [vmem:[#allocation4 + $0xac] ss:$12 sps:$4 sm:$0xff]   ;;  %v776_v53 = vld [vmem:[#allocation4 + $0xb0] ss:$12 sps:$4 sm:$0xff]  }
  0x35   :  { %241 = vmatprep.subr.bf16.mxu0 %v725_v11  ;;  %667 = vmatpush3.bf16.msra.mxu1 %v743_v17  ;;  %v767_v48 = vld [vmem:[#allocation4 + $0xa8] ss:$12 sps:$4 sm:$0xff]   ;;  %v774_v50 = vld [vmem:[#allocation4 + $0x80] ss:$12 sps:$4 sm:$0xff]   ;;  %v775_v52 = vld [vmem:[#allocation4 + $0x98] ss:$12 sps:$4 sm:$0xff]  }
  0x36   :  { %668 = vmatprep.subr.bf16.mxu1 %v839_v0  ;;  %v53_v49 = vld [vmem:[%s939_s1] sm:$0xff]  ;;  %v91_v59 = vshrl.u32 %v90_v58, 7 }
  0x37   :  { %v55_v51 = vpack.c.bf16 %v53_v49, %v53_v49  ;;  %v88_v61 = vld [vmem:[%s942_s4] sm:$0x7] }
  0x38   :  { %242 = vmatpush1.bf16.msra.mxu0 %v727_v13  ;;  %v92_v60 = vsub.s32 0, %v91_v59  ;;  %v96_v62 = vsub.s32 1, %v91_v59  ;;  %v641_v17 = vld [vmem:[%s943_s5] ss:$0 sm:$0xff] }
  0x39   :  { %243 = vmatprep.subr.bf16.mxu0 %v728_v15  ;;  %669 = vmatpush3.bf16.msra.mxu1 %v747_v20  ;;  %v100_v15 = vsub.s32 2, %v91_v59 }
  0x3a   :  { %670 = vmatprep.subr.bf16.mxu1 %v839_v0  ;;  %v93_v63 = vrot.slane %v88_v61, %v92_v60  ;;  %v97_v2 = vrot.slane %v88_v61, %v96_v62 }
  0x3c   :  { %244 = vmatpush1.bf16.msra.mxu0 %v730_v16 }
  0x3d   :  { %245 = vmatprep.subr.bf16.mxu0 %v731_v18  ;;  %671 = vmatpush3.bf16.msra.mxu1 %v751_v24  ;;  %v101_v18 = vrot.slane %v88_v61, %v100_v15 }
  0x3e   :  { %672 = vmatprep.subr.bf16.mxu1 %v839_v0 }
  0x40   :  { %246 = vmatpush1.bf16.msra.mxu0 %v734_v19 }
  0x41   :  { %247 = vmatprep.subr.bf16.mxu0 %v735_v21  ;;  %673 = vmatpush3.bf16.msra.mxu1 %v755_v28 }
  0x42   :  { %674 = vmatprep.subr.bf16.mxu1 %v839_v0 }
  0x44   :  { %248 = vmatpush1.bf16.msra.mxu0 %v738_v22 }
  0x45   :  { %474 = vmatprep.subr.bf16.mxu0 %v742_v25  ;;  %675 = vmatpush3.bf16.msra.mxu1 %v759_v31 }
  0x46   :  { %680 = vmatprep.subr.bf16.mxu1 %v839_v0 }
  0x47   :  { %266 = vmatmul.mubr.bf16.vlgmr.msra.gmra.mrb[0].mxu0 %v54_v26 }
  0x48   :  { %475 = vmatpush1.bf16.msra.mxu0 %v740_v27  ;;  %506 = vmatprep.mubr.bf16.mxu0 %v840_v1 }
  0x49   :  { %476 = vmatprep.subr.bf16.mxu0 %v746_v29  ;;  %677 = vmatmul.mubr.bf16.vlgmr.msra.gmra.mrb[0].mxu1 %v54_v26 }
  0x4a   :  { %681 = vmatpush3.bf16.msra.mxu1 %v766_v34  ;;  %696 = vmatprep.mubr.msk.bf16.mxu1 %vm841_vm0, %v839_v0 }
  0x4b   :  { %682 = vmatprep.subr.bf16.mxu1 %v839_v0 }
  0x4c   :  { %477 = vmatpush1.bf16.msra.mxu0 %v744_v30 }
  0x4d   :  { %478 = vmatprep.subr.bf16.mxu0 %v750_v32 }
  0x4e   :  { %683 = vmatpush3.bf16.msra.mxu1 %v770_v37 }
  0x4f   :  { %684 = vmatprep.subr.bf16.mxu1 %v839_v0 }
  0x50   :  { %479 = vmatpush1.bf16.msra.mxu0 %v748_v33 }
  0x51   :  { %480 = vmatprep.subr.bf16.mxu0 %v754_v35 }
  0x52   :  { %685 = vmatpush3.bf16.msra.mxu1 %v771_v40 }
  0x53   :  { %686 = vmatprep.subr.bf16.mxu1 %v839_v0 }
  0x54   :  { %481 = vmatpush1.bf16.msra.mxu0 %v752_v36 }
  0x55   :  { %482 = vmatprep.subr.bf16.mxu0 %v758_v38 }
  0x56   :  { %687 = vmatpush3.bf16.msra.mxu1 %v772_v43 }
  0x57   :  { %688 = vmatprep.subr.bf16.mxu1 %v839_v0 }
  0x58   :  { %483 = vmatpush1.bf16.msra.mxu0 %v756_v39 }
  0x59   :  { %484 = vmatprep.subr.bf16.mxu0 %v762_v41 }
  0x5a   :  { %689 = vmatpush3.bf16.msra.mxu1 %v773_v46 }
  0x5b   :  { %690 = vmatprep.subr.bf16.mxu1 %v839_v0 }
  0x5c   :  { %485 = vmatpush1.bf16.msra.mxu0 %v760_v42 }
  0x5d   :  { %486 = vmatprep.subr.bf16.mxu0 %v765_v44 }
  0x5e   :  { %691 = vmatpush3.bf16.msra.mxu1 %v774_v50 }
  0x5f   :  { %692 = vmatprep.subr.bf16.mxu1 %v839_v0 }
  0x60   :  { %487 = vmatpush1.bf16.msra.mxu0 %v763_v45 }
  0x61   :  { %488 = vmatprep.subr.bf16.mxu0 %v769_v47 }
  0x62   :  { %693 = vmatpush3.bf16.msra.mxu1 %v775_v52 }
  0x63   :  { %694 = vmatprep.subr.bf16.mxu1 %v839_v0 }
  0x64   :  { %489 = vmatpush1.bf16.msra.mxu0 %v767_v48 }
  0x66   :  { %695 = vmatpush3.bf16.msra.mxu1 %v776_v53 }
  0x67   :  { %507 = vmatmul.mubr.bf16.vlgmr.msra.gmra.mrb[0].mxu0 %v55_v51 }
  0x69   :  { %697 = vmatmul.mubr.bf16.vlgmr.msra.gmra.mrb[4].mxu1 %v55_v51 }
 0x11c   :  { %v308_v54 = vpop.f32.mrb[0].mxu1 }
 0x11d   :  { %v678_v55 = vpop.f32.mrb[1].mxu1  ;;  %v309_v22 = vadd.f32 %v308_v54, %v101_v18 }
 0x11e   :  { %v311_v56 = vpop.f32.mrb[2].mxu1 }
 0x11f   :  { %v679_v57 = vpop.f32.mrb[3].mxu1 }
 0x13a   :  { %v508_v1 = vpop.f32.mrb[0].mxu0 }
 0x13b   :  { %v700_v3 = vadd.f32 %v508_v1, %v93_v63  ;;  %v510_v4 = vpop.f32.mrb[1].mxu0 }
 0x13c   :  { %v512_v0 = vpop.f32.mrb[2].mxu0  ;;  %v701_v7 = vadd.f32 %v510_v4, %v97_v2  ;;  %v549_v9 = vpop.f32.mrb[4].mxu1 }
 0x13d   :  { %v639_v5 = vmul.f32 -1.442695, %v700_v3  ;;  %v513_v6 = vpop.f32.mrb[3].mxu0  ;;  %v698_v10 = vpop.f32.mrb[5].mxu1  ;;  %v576_v20 = vadd.f32 %v641_v17, %v549_v9 }
 0x13e   :  { %v640_v8 = vmul.f32 -1.442695, %v701_v7  ;;  %v552_v11 = vpop.f32.mrb[6].mxu1 }
 0x13f   :  { %777 = vpow2.f32 %v639_v5  ;;  %v699_v12 = vpop.f32.mrb[7].mxu1 }
 0x140   :  { %779 = vpow2.f32 %v640_v8 }
 0x149   :  { %v778_v13 = vpop.eup %777 }
 0x14a   :  { %v559_v14 = vadd.f32 1.0, %v778_v13  ;;  %v780_v16 = vpop.eup %779 }
 0x14b   :  { %v566_v19 = vadd.f32 1.0, %v780_v16 }
 0x14c   :  { %781 = vrcp.f32 %v559_v14 }
 0x14d   :  { %783 = vrcp.f32 %v566_v19 }
 0x156   :  { %v782_v21 = vpop.eup %781 }
 0x157   :  { %v577_v23 = vmul.f32 %v782_v21, %v576_v20  ;;  %v784_v25 = vpop.eup %783 }
 0x158   :  { %v580_v26 = vsub.f32 1.0, %v784_v25  ;;  %v582_v28 = vmul.f32 %v784_v25, %v53_v49 }
 0x159   :  { %v578_v24 = vadd.f32 %v577_v23, %v309_v22 }
 0x15b   :  { %785 = vtanh.f32 %v578_v24 }
 0x165   :  { %v786_v27 = vpop.eup %785 }
 0x166   :  { %v581_v29 = vmul.f32 %v786_v27, %v580_v26 }
 0x168   :  { %v583_v30 = vadd.f32 %v582_v28, %v581_v29 }
 0x16a   :  { %584 = vst [vmem:[%s944_s6] sm:$0xff] %v583_v30 }
 0x16b   :  { %589 = vsyncpa [#allocation3], 1 }
 0x16c   :  { %590 = vsyncpa [#allocation5], 1 }

</bundles_post_ra>
